<compile_context>
chip_gen: v7x
topology: tpu7x:2x2x1
jax: 0.10.0
libtpu: 0.0.40
codegen_flags: <defaults>
</compile_context>

<pallas_src>
import jax
import jax.numpy as jnp
from jax.experimental import pallas as pl
from jax.experimental.pallas import tpu as pltpu

NEG_SLOPE = 0.01          # nn.LeakyReLU default
BN_EPS = 1e-5             # nn.BatchNorm1d default

INPUT_SIZE = 16
L0, L1, L2 = 64, 64, 32   # layer_sizes
OUTPUT_SIZE = 8
LANES = 128               # lane width of the packed parameter slabs

# ---- packed bf16 weight-slab row layout (one (W_ROWS, 128) buffer) ----------
R_WA = 0                      # 16 rows : [W0*s0 (64) | Wi0 (64)]
R_WB = R_WA + INPUT_SIZE      # 64 rows : [W1*s1 (64) | Wi2 (32) | 0]
R_WC = R_WB + L0              # 64 rows : [W2*s2 (32) | 0]
R_WF = R_WC + L1              # 32 rows : [Wf (8) | 0]
W_ROWS = R_WF + L2            # = 176 (multiple of 16 -> bf16 sublane aligned)

BIAS_ROWS = 8                 # separate f32 block: rows 0..3 used
MAX_TILE_B = 1024             # default batch-tile cap (sweepable 512-2048)


def _leaky(x):
    return jnp.where(x > 0, x, NEG_SLOPE * x)


def _fold_bn(g, b, m, v, eps=BN_EPS):
    s = g / jnp.sqrt(v + eps)
    return s, b - m * s


# -----------------------------------------------------------------------------
# Kernel: one grid step processes TILE_B batch rows; the whole network is
# 4 MXU dots (bf16 in, f32 accumulate) + VPU elementwise, all resident in VMEM.
# -----------------------------------------------------------------------------
def advanced_net_kernel(x_ref, w_ref, b_ref, o_ref):
    f32 = jnp.float32
    bf16 = jnp.bfloat16

    x = x_ref[...].astype(bf16)                           # (TB, 16)

    # bf16 weight slab; every slice is 16-row aligned (bf16 sublane packing).
    w_a = w_ref[R_WA:R_WA + INPUT_SIZE, :]                # (16, 128)
    w_b = w_ref[R_WB:R_WB + L0, :]                        # (64, 128)
    w_c = w_ref[R_WC:R_WC + L1, :]                        # (64, 128)
    w_f = w_ref[R_WF:R_WF + L2, :]                        # (32, 128)

    # One aligned (8,128) f32 load for all bias/shift rows, sliced in-vreg.
    b_all = b_ref[...]
    b_a = b_all[0:1, :]                                   # [t0 | bi0]
    b_b = b_all[1:2, :]                                   # [t1 | bi2 | 0]
    b_c = b_all[2:3, :]                                   # [t2 | 0]
    b_f = b_all[3:4, :]                                   # [bf | 0]

    # --- layer 0: ResidualBlock(16 -> 64), main + identity branch in one dot.
    # TODO(synk): Dropout omitted (inference mode -> identity).
    z = jnp.dot(x, w_a, preferred_element_type=f32) + b_a
    x0 = _leaky(z[:, :L0]) + z[:, L0:2 * L0]              # (TB, 64) f32

    # --- layer 1: Linear(64->64, no bias) + BN + LeakyReLU (+ Dropout = id),
    #     with RB2's identity branch (x0 @ Wi2 + bi2) fused into the same dot
    #     (per AdvancedNet.forward, the identity for RB2 is RB0's output x0).
    z = jnp.dot(x0.astype(bf16), w_b, preferred_element_type=f32) + b_b
    x1 = _leaky(z[:, :L1])                                # (TB, 64) f32
    idt2 = z[:, L1:L1 + L2]                               # (TB, 32) f32

    # --- layer 2: ResidualBlock(64 -> 32) main branch + stored identity.
    z = jnp.dot(x1.astype(bf16), w_c, preferred_element_type=f32) + b_c
    x2 = _leaky(z[:, :L2]) + idt2                         # (TB, 32) f32

    # --- final Linear(32 -> 8); store only the 8 useful columns
    #     (16x fewer HBM writeback bytes than a lane-padded slab).
    z = jnp.dot(x2.astype(bf16), w_f, preferred_element_type=f32)
    o_ref[...] = z[:, :OUTPUT_SIZE] + b_f[:, :OUTPUT_SIZE]


# -----------------------------------------------------------------------------
# Host-side parameter handling
# -----------------------------------------------------------------------------
def init_raw_params(key):
    """Deterministic synthetic PyTorch-style parameters (weights as (in,out))."""
    ks = jax.random.split(key, 12)

    def lin_w(k, fin, fout):
        return 0.1 * jax.random.normal(k, (fin, fout), jnp.float32)

    def bn_stats(k, f):
        k1, k2, k3, k4 = jax.random.split(k, 4)
        return dict(
            g=1.0 + 0.1 * jax.random.normal(k1, (f,), jnp.float32),
            b=0.1 * jax.random.normal(k2, (f,), jnp.float32),
            m=0.05 * jax.random.normal(k3, (f,), jnp.float32),
            v=jnp.abs(1.0 + 0.1 * jax.random.normal(k4, (f,), jnp.float32)),
        )

    bn0 = bn_stats(ks[1], L0)
    bn1 = bn_stats(ks[5], L1)
    bn2 = bn_stats(ks[7], L2)
    return dict(
        w0=lin_w(ks[0], INPUT_SIZE, L0),
        g0=bn0["g"], b0=bn0["b"], m0=bn0["m"], v0=bn0["v"],
        wi0=lin_w(ks[2], INPUT_SIZE, L0),
        bi0=0.1 * jax.random.normal(ks[3], (L0,), jnp.float32),
        w1=lin_w(ks[4], L0, L1),
        g1=bn1["g"], b1=bn1["b"], m1=bn1["m"], v1=bn1["v"],
        w2=lin_w(ks[6], L1, L2),
        g2=bn2["g"], b2=bn2["b"], m2=bn2["m"], v2=bn2["v"],
        wi2=lin_w(ks[8], L1, L2),
        bi2=0.1 * jax.random.normal(ks[9], (L2,), jnp.float32),
        wf=lin_w(ks[10], L2, OUTPUT_SIZE),
        bf=0.1 * jax.random.normal(ks[11], (OUTPUT_SIZE,), jnp.float32),
    )


def pack_params(raw):
    """Fold BN into weights, fuse residual branches, pack into:
       - one (176,128) bf16 weight slab (MXU-native inputs, half the DMA bytes)
       - one (8,128) f32 bias/shift block (elementwise math stays f32)."""
    # TODO(synk): BatchNorm training-mode batch statistics not implemented
    # (eval-mode running stats are folded into the weights/shifts).
    s0, t0 = _fold_bn(raw["g0"], raw["b0"], raw["m0"], raw["v0"])
    s1, t1 = _fold_bn(raw["g1"], raw["b1"], raw["m1"], raw["v1"])
    s2, t2 = _fold_bn(raw["g2"], raw["b2"], raw["m2"], raw["v2"])

    w = jnp.zeros((W_ROWS, LANES), jnp.float32)
    # fused RB0 weights: [W0*s0 | Wi0]
    w = w.at[R_WA:R_WA + INPUT_SIZE, 0:L0].set(raw["w0"] * s0)
    w = w.at[R_WA:R_WA + INPUT_SIZE, L0:2 * L0].set(raw["wi0"])
    # fused layer-1 + RB2-identity weights: [W1*s1 | Wi2 | 0]
    w = w.at[R_WB:R_WB + L0, 0:L1].set(raw["w1"] * s1)
    w = w.at[R_WB:R_WB + L0, L1:L1 + L2].set(raw["wi2"])
    # RB2 main-branch weights: [W2*s2 | 0]
    w = w.at[R_WC:R_WC + L1, 0:L2].set(raw["w2"] * s2)
    # final: [Wf | 0]
    w = w.at[R_WF:R_WF + L2, 0:OUTPUT_SIZE].set(raw["wf"])

    b = jnp.zeros((BIAS_ROWS, LANES), jnp.float32)
    b = b.at[0, 0:L0].set(t0)
    b = b.at[0, L0:2 * L0].set(raw["bi0"])
    b = b.at[1, 0:L1].set(t1)
    b = b.at[1, L1:L1 + L2].set(raw["bi2"])
    b = b.at[2, 0:L2].set(t2)
    b = b.at[3, 0:OUTPUT_SIZE].set(raw["bf"])
    return w.astype(jnp.bfloat16), b


def advanced_net_forward(x, w_slab, biases, tile_b=None):
    batch = x.shape[0]
    if tile_b is None:
        # Large tiles amortize the ~0.35 us per-grid-step overhead; keep >=2
        # grid steps when the batch allows so the "parallel" batch axis can
        # shard across both TensorCores on v7x (v5e/v6e have a single TC).
        target = min(MAX_TILE_B, pl.cdiv(batch, 2))
        tile_b = max(8, ((target + 7) // 8) * 8)
    assert tile_b % 8 == 0, "tile_b must be a multiple of 8 sublanes"

    # Pad ragged batches host-side instead of asserting.
    padded = pl.cdiv(batch, tile_b) * tile_b
    if padded != batch:
        x = jnp.pad(x, ((0, padded - batch), (0, 0)))
    grid = (padded // tile_b,)

    out = pl.pallas_call(
        advanced_net_kernel,
        out_shape=jax.ShapeDtypeStruct((padded, OUTPUT_SIZE), jnp.float32),
        grid_spec=pltpu.PrefetchScalarGridSpec(
            num_scalar_prefetch=0,
            grid=grid,
            in_specs=[
                pl.BlockSpec((tile_b, INPUT_SIZE), lambda i: (i, 0)),
                # constant index_map -> DMA'd once, stays resident in VMEM
                pl.BlockSpec((W_ROWS, LANES), lambda i: (0, 0)),
                pl.BlockSpec((BIAS_ROWS, LANES), lambda i: (0, 0)),
            ],
            # dense (tile_b, 8) output block: full-array last dim, 16x fewer
            # writeback bytes than a lane-padded (tile_b, 128) slab.
            out_specs=pl.BlockSpec((tile_b, OUTPUT_SIZE), lambda i: (i, 0)),
        ),
        compiler_params=pltpu.CompilerParams(
            dimension_semantics=("parallel",),
            # Default scoped VMEM is plenty for tile_b <= 2048; raise
            # vmem_limit_bytes only when sweeping >=4096-row tiles on v5e.
        ),
    )(x, w_slab, biases)
    return out if padded == batch else out[:batch]


# -----------------------------------------------------------------------------
# Pure-JAX f32 reference (unfused, raw params) following AdvancedNet.forward
# -----------------------------------------------------------------------------
def reference_forward(x, raw):
    def bn(z, g, b, m, v):
        return (z - m) / jnp.sqrt(v + BN_EPS) * g + b

    identity = x
    # layer 0: ResidualBlock(16 -> 64)
    out = _leaky(bn(x @ raw["w0"], raw["g0"], raw["b0"], raw["m0"], raw["v0"]))
    x = out + (identity @ raw["wi0"] + raw["bi0"])
    identity = x                                    # identity updated only here
    # layer 1: Linear(no bias) + BN + LeakyReLU (+ Dropout = identity)
    x = _leaky(bn(x @ raw["w1"], raw["g1"], raw["b1"], raw["m1"], raw["v1"]))
    # layer 2: ResidualBlock(64 -> 32); identity is still RB0's output
    out = _leaky(bn(x @ raw["w2"], raw["g2"], raw["b2"], raw["m2"], raw["v2"]))
    x = out + (identity @ raw["wi2"] + raw["bi2"])
    # final Linear(32 -> 8)
    return x @ raw["wf"] + raw["bf"]


if __name__ == "__main__":
    key = jax.random.PRNGKey(0)
    kx, kp = jax.random.split(key)

    BATCH = 250   # deliberately not a multiple of 8: exercises host-side padding
    x = jax.random.normal(kx, (BATCH, INPUT_SIZE), jnp.float32)
    raw = init_raw_params(kp)
    w_slab, biases = pack_params(raw)

    out = advanced_net_forward(x, w_slab, biases)
    out = jax.block_until_ready(out)

    ref = reference_forward(x, raw)
    assert out.shape == (BATCH, OUTPUT_SIZE)
    max_err = float(jnp.max(jnp.abs(out - ref)))
    # bf16 matmul inputs (f32 accumulation) -> tolerance loosened vs f32-only.
    assert max_err < 3e-2, f"max abs err {max_err}"

    print("KERNEL_OK")
</pallas_src>

<mosaic_0001>
module attributes {stable_mosaic.version = 11 : i64} {
  func.func @advanced_net_kernel(%arg0: i32, %arg1: memref<128x16xf32, #tpu.memory_space<vmem>>, %arg2: memref<176x128xbf16, #tpu.memory_space<vmem>>, %arg3: memref<8x128xf32, #tpu.memory_space<vmem>>, %arg4: memref<128x8xf32, #tpu.memory_space<vmem>>) attributes {dimension_semantics = [#tpu.dimension_semantics<parallel>], iteration_bounds = array<i64: 2>, scalar_prefetch = 0 : i64, scratch_operands = 0 : i64, tpu.core_type = #tpu.core_type<tc>, window_params = [{transform_indices = @transform_0, window_bounds = array<i64: 128, 16>}, {pipeline_mode = #tpu.pipeline_mode<synchronous>, transform_indices = @transform_1, window_bounds = array<i64: 176, 128>}, {pipeline_mode = #tpu.pipeline_mode<synchronous>, transform_indices = @transform_2, window_bounds = array<i64: 8, 128>}, {transform_indices = @transform_3, window_bounds = array<i64: 128, 8>}]} {
    %c0 = arith.constant 0 : index
    %c0_0 = arith.constant 0 : index
    %0 = vector.load %arg1[%c0, %c0_0] : memref<128x16xf32, #tpu.memory_space<vmem>>, vector<128x16xf32>
    %1 = arith.truncf %0 : vector<128x16xf32> to vector<128x16xbf16>
    %c0_1 = arith.constant 0 : index
    %c0_2 = arith.constant 0 : index
    %2 = vector.load %arg2[%c0_1, %c0_2] : memref<176x128xbf16, #tpu.memory_space<vmem>>, vector<16x128xbf16>
    %c16 = arith.constant 16 : index
    %c0_3 = arith.constant 0 : index
    %3 = vector.load %arg2[%c16, %c0_3] : memref<176x128xbf16, #tpu.memory_space<vmem>>, vector<64x128xbf16>
    %c80 = arith.constant 80 : index
    %c0_4 = arith.constant 0 : index
    %4 = vector.load %arg2[%c80, %c0_4] : memref<176x128xbf16, #tpu.memory_space<vmem>>, vector<64x128xbf16>
    %c144 = arith.constant 144 : index
    %c0_5 = arith.constant 0 : index
    %5 = vector.load %arg2[%c144, %c0_5] : memref<176x128xbf16, #tpu.memory_space<vmem>>, vector<32x128xbf16>
    %c0_6 = arith.constant 0 : index
    %c0_7 = arith.constant 0 : index
    %6 = vector.load %arg3[%c0_6, %c0_7] : memref<8x128xf32, #tpu.memory_space<vmem>>, vector<8x128xf32>
    %7 = vector.extract_strided_slice %6 {offsets = [0, 0], sizes = [1, 128], strides = [1, 1]} : vector<8x128xf32> to vector<1x128xf32>
    %8 = vector.extract_strided_slice %6 {offsets = [1, 0], sizes = [1, 128], strides = [1, 1]} : vector<8x128xf32> to vector<1x128xf32>
    %9 = vector.extract_strided_slice %6 {offsets = [2, 0], sizes = [1, 128], strides = [1, 1]} : vector<8x128xf32> to vector<1x128xf32>
    %10 = vector.extract_strided_slice %6 {offsets = [3, 0], sizes = [1, 128], strides = [1, 1]} : vector<8x128xf32> to vector<1x128xf32>
    %cst = arith.constant dense<0.000000e+00> : vector<128x128xf32>
    %11 = tpu.matmul %1, %2, %cst {dimension_numbers = #tpu.dot_dimension_numbers<[1], [0], [0], [1], [0, 0, 1, 1], [], []>} : vector<128x16xbf16>, vector<16x128xbf16>, vector<128x128xf32> -> vector<128x128xf32>
    %12 = vector.broadcast %7 : vector<1x128xf32> to vector<128x128xf32>
    %13 = arith.addf %11, %12 : vector<128x128xf32>
    %14 = vector.extract_strided_slice %13 {offsets = [0, 0], sizes = [128, 64], strides = [1, 1]} : vector<128x128xf32> to vector<128x64xf32>
    %cst_8 = arith.constant 0.000000e+00 : f32
    %15 = vector.broadcast %cst_8 : f32 to vector<128x64xf32>
    %16 = arith.cmpf ogt, %14, %15 : vector<128x64xf32>
    %cst_9 = arith.constant 0.00999999977 : f32
    %17 = vector.broadcast %cst_9 : f32 to vector<128x64xf32>
    %18 = arith.mulf %17, %14 : vector<128x64xf32>
    %19 = arith.select %16, %14, %18 : vector<128x64xi1>, vector<128x64xf32>
    %20 = vector.extract_strided_slice %13 {offsets = [0, 64], sizes = [128, 64], strides = [1, 1]} : vector<128x128xf32> to vector<128x64xf32>
    %21 = arith.addf %19, %20 : vector<128x64xf32>
    %22 = arith.truncf %21 : vector<128x64xf32> to vector<128x64xbf16>
    %cst_10 = arith.constant dense<0.000000e+00> : vector<128x128xf32>
    %23 = tpu.matmul %22, %3, %cst_10 {dimension_numbers = #tpu.dot_dimension_numbers<[1], [0], [0], [1], [0, 0, 1, 1], [], []>} : vector<128x64xbf16>, vector<64x128xbf16>, vector<128x128xf32> -> vector<128x128xf32>
    %24 = vector.broadcast %8 : vector<1x128xf32> to vector<128x128xf32>
    %25 = arith.addf %23, %24 : vector<128x128xf32>
    %26 = vector.extract_strided_slice %25 {offsets = [0, 0], sizes = [128, 64], strides = [1, 1]} : vector<128x128xf32> to vector<128x64xf32>
    %cst_11 = arith.constant 0.000000e+00 : f32
    %27 = vector.broadcast %cst_11 : f32 to vector<128x64xf32>
    %28 = arith.cmpf ogt, %26, %27 : vector<128x64xf32>
    %cst_12 = arith.constant 0.00999999977 : f32
    %29 = vector.broadcast %cst_12 : f32 to vector<128x64xf32>
    %30 = arith.mulf %29, %26 : vector<128x64xf32>
    %31 = arith.select %28, %26, %30 : vector<128x64xi1>, vector<128x64xf32>
    %32 = vector.extract_strided_slice %25 {offsets = [0, 64], sizes = [128, 32], strides = [1, 1]} : vector<128x128xf32> to vector<128x32xf32>
    %33 = arith.truncf %31 : vector<128x64xf32> to vector<128x64xbf16>
    %cst_13 = arith.constant dense<0.000000e+00> : vector<128x128xf32>
    %34 = tpu.matmul %33, %4, %cst_13 {dimension_numbers = #tpu.dot_dimension_numbers<[1], [0], [0], [1], [0, 0, 1, 1], [], []>} : vector<128x64xbf16>, vector<64x128xbf16>, vector<128x128xf32> -> vector<128x128xf32>
    %35 = vector.broadcast %9 : vector<1x128xf32> to vector<128x128xf32>
    %36 = arith.addf %34, %35 : vector<128x128xf32>
    %37 = vector.extract_strided_slice %36 {offsets = [0, 0], sizes = [128, 32], strides = [1, 1]} : vector<128x128xf32> to vector<128x32xf32>
    %cst_14 = arith.constant 0.000000e+00 : f32
    %38 = vector.broadcast %cst_14 : f32 to vector<128x32xf32>
    %39 = arith.cmpf ogt, %37, %38 : vector<128x32xf32>
    %cst_15 = arith.constant 0.00999999977 : f32
    %40 = vector.broadcast %cst_15 : f32 to vector<128x32xf32>
    %41 = arith.mulf %40, %37 : vector<128x32xf32>
    %42 = arith.select %39, %37, %41 : vector<128x32xi1>, vector<128x32xf32>
    %43 = arith.addf %42, %32 : vector<128x32xf32>
    %44 = arith.truncf %43 : vector<128x32xf32> to vector<128x32xbf16>
    %cst_16 = arith.constant dense<0.000000e+00> : vector<128x128xf32>
    %45 = tpu.matmul %44, %5, %cst_16 {dimension_numbers = #tpu.dot_dimension_numbers<[1], [0], [0], [1], [0, 0, 1, 1], [], []>} : vector<128x32xbf16>, vector<32x128xbf16>, vector<128x128xf32> -> vector<128x128xf32>
    %46 = vector.extract_strided_slice %45 {offsets = [0, 0], sizes = [128, 8], strides = [1, 1]} : vector<128x128xf32> to vector<128x8xf32>
    %47 = vector.extract_strided_slice %10 {offsets = [0, 0], sizes = [1, 8], strides = [1, 1]} : vector<1x128xf32> to vector<1x8xf32>
    %48 = vector.broadcast %47 : vector<1x8xf32> to vector<128x8xf32>
    %49 = arith.addf %46, %48 : vector<128x8xf32>
    %c0_17 = arith.constant 0 : index
    %c0_18 = arith.constant 0 : index
    %50 = vector.load %arg4[%c0_17, %c0_18] : memref<128x8xf32, #tpu.memory_space<vmem>>, vector<128x8xf32>
    tpu.vector_store %arg4[%c0_17, %c0_18], %49 {strides = array<i32>} : memref<128x8xf32, #tpu.memory_space<vmem>>, vector<128x8xf32>,
    return
  }
  func.func @transform_0(%arg0: i32) -> (i32, i32) {
    %c0_i32 = arith.constant 0 : i32
    %c0_i32_0 = arith.constant 0 : i32
    return %arg0, %c0_i32 : i32, i32
  }
  func.func @transform_1(%arg0: i32) -> (i32, i32) {
    %c0_i32 = arith.constant 0 : i32
    %c0_i32_0 = arith.constant 0 : i32
    %c0_i32_1 = arith.constant 0 : i32
    return %c0_i32, %c0_i32_0 : i32, i32
  }
  func.func @transform_2(%arg0: i32) -> (i32, i32) {
    %c0_i32 = arith.constant 0 : i32
    %c0_i32_0 = arith.constant 0 : i32
    %c0_i32_1 = arith.constant 0 : i32
    return %c0_i32, %c0_i32_0 : i32, i32
  }
  func.func @transform_3(%arg0: i32) -> (i32, i32) {
    %c0_i32 = arith.constant 0 : i32
    %c0_i32_0 = arith.constant 0 : i32
    return %arg0, %c0_i32 : i32, i32
  }
}

</mosaic_0001>

<bundles_post_ra>
// kernel: tpu_custom_call.1
= control target key start
LH: loop header
LB: loop body
LE: loop exit
PB: predicated region body
PF: predicated region fallthrough
CT: control target
= control target key end

     0   :  { %s1440_s12 = smov 0   ;;  %s1754_s0 = inlined_call_operand.vmem [shape: f32[256,16], index: 0, kind: input, shape index: {}]   ;;  %s1755_s1 = inlined_call_operand.vmem [shape: bf16[176,128], index: 1, kind: input, shape index: {}]   ;;  %s1756_s2 = inlined_call_operand.vmem [shape: f32[8,128], index: 2, kind: input, shape index: {}]   ;;  %s1757_s3 = inlined_call_operand.vmem [shape: f32[256,8], index: 3, kind: output, shape index: {}]  }
   0x1 LB: > { %s1208_s13 = sadd.s32 4294967295, %s1417_s12   ;;  %p1212_p0 = scmp.ge.s32.totalorder %s1417_s12, 1  ;;  %s1417_s12 = sphi %s1440_s12, %s13_s12  }
   0x2   : > { %p138_p1 = scmp.lt.s32.totalorder %s1417_s12, 3 }
   0x4   : > { %p139_p2 = pnand %p1212_p0, %p138_p1 }
   0x5   : > { %v1400_v0 = vld [vmem:[%s1755_s1] sm:$0xff] (!%p139_p2)   ;;  %s1213_s16 = sshll.u32 (!%p139_p2), %s1208_s13, 4  ;;  %vm232_vm0 = vcmask (!%p139_p2), 130048   ;;  %v1401_v25 = vld [vmem:[%s1755_s1 + $0x8] sm:$0xff] (!%p139_p2)   ;;  %v1402_v26 = vld [vmem:[%s1755_s1 + $0x10] sm:$0xff] (!%p139_p2)   ;;  %v222_v27 = vlaneseq (!%p139_p2)  ;;  %s1419_s4 = smov (!%p139_p2), 64  }
   0x6   : > { %142 = sbr.rel (%p139_p2) target bundleno = 1050 (0x41a), region = 32  ;;  %p163_p3 = scmp.lt.s32.totalorder (!%p139_p2), %s1213_s16, 31  ;;  %1305 = vmatprep.subr.bf16.mxu0 (!%p139_p2), %v1400_v0  ;;  %1323 = vmatprep.subr.bf16.mxu1 (!%p139_p2), %v1401_v25  ;;  %v1403_v29 = vld [vmem:[%s1755_s1 + $0x18] sm:$0xff] (!%p139_p2)   ;;  %v1500_v31 = vld [vmem:[%s1756_s2] sm:$0xff] (!%p139_p2)  ;;  %v1405_v60 = vld [vmem:[%s1755_s1 + $0x28] sm:$0xff] (!%p139_p2)   ;;  %vm518_vm5 = vcmask (!%p139_p2), 523264  }
   0x7   : > { %1306 = vmatpush3.bf16.msra.mxu0 (!%p139_p2), %v1400_v0  ;;  %1324 = vmatpush3.bf16.msra.mxu1 (!%p139_p2), %v1401_v25  ;;  %v1491_v28 = vshrl.u32 (!%p139_p2), %v222_v27, 7  ;;  %v1404_v32 = vld [vmem:[%s1755_s1 + $0x20] sm:$0xff] (!%p139_p2)   ;;  %v1406_v61 = vld [vmem:[%s1755_s1 + $0x30] sm:$0xff] (!%p139_p2)  }
   0x8   : > { %1325 = vmatprep.subr.bf16.mxu1 (!%p139_p2), %v1402_v26  ;;  %1347 = vmatprep.subr.bf16.mxu0 (!%p139_p2), %v1405_v60 }
   0x9   : > { %v224_v30 = vsub.s32 (!%p139_p2), 0, %v1491_v28 }
   0xb   : > { %1326 = vmatpush3.bf16.msra.mxu1 (!%p139_p2), %v1402_v26  ;;  %v225_v33 = vrot.slane (!%p139_p2), %v1500_v31, %v224_v30 }
   0xc   : > { %1327 = vmatprep.subr.bf16.mxu1 (!%p139_p2), %v1403_v29 }
   0xd   : > { %s1759_s16 = smov (!%p163_p3, %s1213_s16), 31 }
   0xe   : > { %s1214_s17 = sshll.u32 %s1759_s16, 3 }
   0xf   : > { %s1459_s20 = scalar_lea.vmem %s1754_s0, %s1214_s17  ;;  %1328 = vmatpush3.bf16.msra.mxu1 %v1403_v29  ;;  %s1717_s22 = scalar_lea.vmem %s1757_s3, %s1214_s17 }
  0x10   : > { %v175_v1 = vld [vmem:[%s1459_s20] sm:$0xff]  ;;  %v176_v2 = vld [vmem:[%s1459_s20 + $0x8] sm:$0xff]  ;;  %v177_v3 = vld [vmem:[%s1459_s20 + $0x10] sm:$0xff]  ;;  %1329 = vmatprep.subr.bf16.mxu1 %v1404_v32 }
  0x11   : > { %v191_v4 = vpack.c.bf16 %v176_v2, %v175_v1  ;;  %v178_v5 = vld [vmem:[%s1459_s20 + $0x18] sm:$0xff]  ;;  %v179_v6 = vld [vmem:[%s1459_s20 + $0x20] sm:$0xff]  ;;  %v180_v7 = vld [vmem:[%s1459_s20 + $0x28] sm:$0xff] }
  0x12   : > { %v192_v8 = vpack.c.bf16 %v178_v5, %v177_v3  ;;  %v193_v9 = vpack.c.bf16 %v180_v7, %v179_v6  ;;  %v181_v10 = vld [vmem:[%s1459_s20 + $0x30] sm:$0xff]  ;;  %v182_v11 = vld [vmem:[%s1459_s20 + $0x38] sm:$0xff]  ;;  %v183_v12 = vld [vmem:[%s1459_s20 + $0x40] sm:$0xff] }
  0x13   : > { %1307 = vmatprep.mubr.msk.bf16.mxu0 %vm232_vm0, %v191_v4  ;;  %v184_v13 = vld [vmem:[%s1459_s20 + $0x48] sm:$0xff]  ;;  %v194_v14 = vpack.c.bf16 %v182_v11, %v181_v10  ;;  %v185_v16 = vld [vmem:[%s1459_s20 + $0x50] sm:$0xff]  ;;  %v186_v17 = vld [vmem:[%s1459_s20 + $0x58] sm:$0xff]  ;;  %1330 = vmatpush3.bf16.msra.mxu1 %v1404_v32 }
  0x14   : > { %1308 = vmatmul.mubr.msk.bf16.vlgmr.msra.gmra.mrb[0].mxu0 %vm232_vm0, %v192_v8  ;;  %v195_v15 = vpack.c.bf16 %v184_v13, %v183_v12  ;;  %v187_v18 = vld [vmem:[%s1459_s20 + $0x60] sm:$0xff]  ;;  %v188_v19 = vld [vmem:[%s1459_s20 + $0x68] sm:$0xff]  ;;  %v196_v20 = vpack.c.bf16 %v186_v17, %v185_v16  ;;  %v189_v22 = vld [vmem:[%s1459_s20 + $0x70] sm:$0xff] }
  0x15   : > { %1311 = vmatprep.mubr.msk.bf16.mxu0 %vm232_vm0, %v193_v9  ;;  %v197_v21 = vpack.c.bf16 %v188_v19, %v187_v18  ;;  %v190_v23 = vld [vmem:[%s1459_s20 + $0x78] sm:$0xff]  ;;  %1348 = vmatpush3.bf16.msra.mxu0 %v1405_v60 }
  0x16   : > { %v198_v24 = vpack.c.bf16 %v190_v23, %v189_v22  ;;  %1349 = vmatprep.subr.bf16.mxu0 %v1406_v61  ;;  %v1407_v2 = vld [vmem:[%s1755_s1 + $0x38] sm:$0xff]  }
  0x19   : > { %1350 = vmatpush3.bf16.msra.mxu0 %v1406_v61 }
  0x1a   : > { %1351 = vmatprep.subr.bf16.mxu0 %v1407_v2 }
  0x1c   : > { %1312 = vmatmul.mubr.msk.bf16.gmra.mrb[4].mxu0 %vm232_vm0, %v194_v14 }
  0x1d   : > { %1315 = vmatprep.mubr.msk.bf16.mxu0 %vm232_vm0, %v195_v15  ;;  %1352 = vmatpush3.bf16.msra.mxu0 %v1407_v2 }
  0x24   : > { %1316 = vmatmul.mubr.msk.bf16.gmra.mrb[8].mxu0 %vm232_vm0, %v196_v20 }
  0x25   : > { %1319 = vmatprep.mubr.msk.bf16.mxu0 %vm232_vm0, %v197_v21 }
  0x2c   : > { %1320 = vmatmul.mubr.msk.bf16.gmra.mrb[12].mxu0 %vm232_vm0, %v198_v24 }
  0xe7   : > { %v1309_v34 = vpop.f32.mrb[0].mxu0 }
  0xe8   : > { %v1506_v35 = vadd.f32 %v1309_v34, %v225_v33  ;;  %v291_v36 = vpop.f32.mrb[1].mxu0 }
  0xe9   : > { %v1508_v37 = vadd.f32 %v291_v36, %v225_v33  ;;  %v1310_v38 = vpop.f32.mrb[2].mxu0 }
  0xea   : > { %422 = vrot.lane.b32.xlu1 %v1506_v35, %s1419_s4  ;;  %v294_v39 = vpop.f32.mrb[3].mxu0  ;;  %v303_v40 = vadd.f32 %v1310_v38, %v225_v33  ;;  %v372_v6 = vmul.f32 0.01, %v1506_v35  ;;  %vm356_vm1 = vcmp.gt.f32.partialorder %v1506_v35, 0.0 }
  0xeb   : > { %418 = vrot.lane.b32.xlu0 %v1508_v37, %s1419_s4  ;;  %v1514_v41 = vadd.f32 %v294_v39, %v225_v33  ;;  %v370_v9 = vmul.f32 0.01, %v1508_v37  ;;  %vm354_vm3 = vcmp.gt.f32.partialorder %v1508_v37, 0.0 }
  0xec   : > { %v373_v7 = vmul.f32 0.01, %v303_v40  ;;  %vm357_vm2 = vcmp.gt.f32.partialorder %v303_v40, 0.0  ;;  %v388_v11 = vsel %vm356_vm1, %v1506_v35, %v372_v6 }
  0xed   : > { %v371_v10 = vmul.f32 0.01, %v1514_v41  ;;  %vm355_vm4 = vcmp.gt.f32.partialorder %v1514_v41, 0.0  ;;  %v386_v15 = vsel %vm354_vm3, %v1508_v37, %v370_v9 }
  0xee   : > { %424 = vrot.lane.b32.xlu1 %v303_v40, %s1419_s4  ;;  %v389_v13 = vsel %vm357_vm2, %v303_v40, %v373_v7 }
  0xef   : > { %v1313_v42 = vpop.f32.mrb[4].mxu0  ;;  %420 = vrot.lane.b32.xlu0 %v1514_v41, %s1419_s4  ;;  %v387_v17 = vsel %vm355_vm4, %v1514_v41, %v371_v10 }
  0xf0   : > { %v307_v43 = vpop.f32.mrb[5].mxu0  ;;  %v1525_v48 = vadd.f32 %v1313_v42, %v225_v33 }
  0xf1   : > { %v1519_v44 = vadd.f32 %v307_v43, %v225_v33  ;;  %v1314_v45 = vpop.f32.mrb[6].mxu0 }
  0xf2   : > { %v310_v46 = vpop.f32.mrb[7].mxu0  ;;  %v1529_v49 = vadd.f32 %v1314_v45, %v225_v33  ;;  %v376_v30 = vmul.f32 0.01, %v1525_v48  ;;  %vm360_vm8 = vcmp.gt.f32.partialorder %v1525_v48, 0.0 }
  0xf3   : > { %v1521_v47 = vadd.f32 %v310_v46, %v225_v33  ;;  %426 = vrot.lane.b32.xlu0 %v1519_v44, %s1419_s4  ;;  %v374_v22 = vmul.f32 0.01, %v1519_v44  ;;  %vm358_vm6 = vcmp.gt.f32.partialorder %v1519_v44, 0.0 }
  0xf4   : > { %v377_v32 = vmul.f32 0.01, %v1529_v49  ;;  %vm361_vm9 = vcmp.gt.f32.partialorder %v1529_v49, 0.0  ;;  %v392_v37 = vsel %vm360_vm8, %v1525_v48, %v376_v30 }
  0xf5   : > { %428 = vrot.lane.b32.xlu1 %v1521_v47, %s1419_s4  ;;  %v375_v23 = vmul.f32 0.01, %v1521_v47  ;;  %vm359_vm7 = vcmp.gt.f32.partialorder %v1521_v47, 0.0  ;;  %v390_v26 = vsel %vm358_vm6, %v1519_v44, %v374_v22 }
  0xf6   : > { %v393_v38 = vsel %vm361_vm9, %v1529_v49, %v377_v32 }
  0xf7   : > { %v1317_v50 = vpop.f32.mrb[8].mxu0  ;;  %430 = vrot.lane.b32.xlu0 %v1525_v48, %s1419_s4  ;;  %v391_v29 = vsel %vm359_vm7, %v1521_v47, %v375_v23 }
  0xf8   : > { %v323_v51 = vpop.f32.mrb[9].mxu0  ;;  %v1541_v56 = vadd.f32 %v1317_v50, %v225_v33 }
  0xf9   : > { %v1533_v52 = vadd.f32 %v323_v51, %v225_v33  ;;  %v1318_v53 = vpop.f32.mrb[10].mxu0  ;;  %432 = vrot.lane.b32.xlu1 %v1529_v49, %s1419_s4 }
  0xfa   : > { %v326_v54 = vpop.f32.mrb[11].mxu0  ;;  %v1545_v57 = vadd.f32 %v1318_v53, %v225_v33  ;;  %v380_v49 = vmul.f32 0.01, %v1541_v56  ;;  %vm364_vm12 = vcmp.gt.f32.partialorder %v1541_v56, 0.0 }
  0xfb   : > { %v1537_v55 = vadd.f32 %v326_v54, %v225_v33  ;;  %434 = vrot.lane.b32.xlu0 %v1533_v52, %s1419_s4  ;;  %v378_v40 = vmul.f32 0.01, %v1533_v52  ;;  %vm362_vm10 = vcmp.gt.f32.partialorder %v1533_v52, 0.0 }
  0xfc   : > { %v381_v50 = vmul.f32 0.01, %v1545_v57  ;;  %vm365_vm13 = vcmp.gt.f32.partialorder %v1545_v57, 0.0 }
  0xfd   : > { %436 = vrot.lane.b32.xlu1 %v1537_v55, %s1419_s4  ;;  %v379_v41 = vmul.f32 0.01, %v1537_v55  ;;  %vm363_vm11 = vcmp.gt.f32.partialorder %v1537_v55, 0.0  ;;  %v394_v46 = vsel %vm362_vm10, %v1533_v52, %v378_v40 }
  0xfe   : > { %v397_v52 = vsel %vm365_vm13, %v1545_v57, %v381_v50 }
  0xff   : > { %v1321_v58 = vpop.f32.mrb[12].mxu0  ;;  %438 = vrot.lane.b32.xlu0 %v1541_v56, %s1419_s4  ;;  %v395_v47 = vsel %vm363_vm11, %v1537_v55, %v379_v41 }
 0x100   : > { %v339_v59 = vpop.f32.mrb[13].mxu0  ;;  %v1566_v3 = vadd.f32 %v1321_v58, %v225_v33 }
 0x101   : > { %v1555_v62 = vadd.f32 %v339_v59, %v225_v33  ;;  %v1322_v63 = vpop.f32.mrb[14].mxu0  ;;  %440 = vrot.lane.b32.xlu1 %v1545_v57, %s1419_s4  ;;  %v396_v59 = vsel %vm364_vm12, %v1541_v56, %v380_v49 }
 0x102   : > { %v342_v0 = vpop.f32.mrb[15].mxu0  ;;  %v1570_v4 = vadd.f32 %v1322_v63, %v225_v33  ;;  %v384_v7 = vmul.f32 0.01, %v1566_v3  ;;  %vm368_vm0 = vcmp.gt.f32.partialorder %v1566_v3, 0.0 }
 0x103   : > { %v1559_v1 = vadd.f32 %v342_v0, %v225_v33  ;;  %442 = vrot.lane.b32.xlu0 %v1555_v62, %s1419_s4  ;;  %v382_v60 = vmul.f32 0.01, %v1555_v62  ;;  %vm366_vm14 = vcmp.gt.f32.partialorder %v1555_v62, 0.0 }
 0x104   : > { %vm369_vm1 = vcmp.gt.f32.partialorder %v1570_v4, 0.0 }
 0x105   : > { %444 = vrot.lane.b32.xlu1 %v1559_v1, %s1419_s4  ;;  %v383_v61 = vmul.f32 0.01, %v1559_v1  ;;  %vm367_vm15 = vcmp.gt.f32.partialorder %v1559_v1, 0.0  ;;  %v398_v6 = vsel %vm366_vm14, %v1555_v62, %v382_v60 }
 0x107   : > { %446 = vrot.lane.b32.xlu0 %v1566_v3, %s1419_s4  ;;  %v399_v56 = vsel %vm367_vm15, %v1559_v1, %v383_v61 }
 0x109   : > { %448 = vrot.lane.b32.xlu1 %v1570_v4, %s1419_s4 }
 0x15c   : > { %v423_v5 = vpop.permute.xlu1 %422 }
 0x15d   : > { %v419_v8 = vpop.permute.xlu0 %418  ;;  %v468_v14 = vadd.f32 %v423_v5, %v388_v11 }
 0x15e   : > { %v466_v19 = vadd.f32 %v419_v8, %v386_v15  ;;  %v385_v8 = vmul.f32 0.01, %v1570_v4 }
 0x160   : > { %v425_v12 = vpop.permute.xlu1 %424  ;;  %v401_v62 = vsel %vm369_vm1, %v1570_v4, %v385_v8 }
 0x161   : > { %v469_v16 = vadd.f32 %v425_v12, %v389_v13  ;;  %v421_v18 = vpop.permute.xlu0 %420  ;;  %v400_v13 = vsel %vm368_vm0, %v1566_v3, %v384_v7  ;;  %v1410_v7 = vld [vmem:[%s1755_s1 + $0x50] sm:$0xff]  }
 0x162   : > { %v467_v20 = vadd.f32 %v421_v18, %v387_v17  ;;  %v1408_v17 = vld [vmem:[%s1755_s1 + $0x40] sm:$0xff]   ;;  %v492_v18 = vsub.s32 1, %v1491_v28 }
 0x163   : > { %v483_v21 = vpack.c.bf16 %v469_v16, %v468_v14  ;;  %1353 = vmatprep.subr.bf16.mxu0 %v1408_v17 }
 0x164   : > { %v482_v24 = vpack.c.bf16 %v467_v20, %v466_v19  ;;  %1354 = vmatpush3.bf16.msra.mxu0 %v1408_v17  ;;  %v1634_v3 = vrot.slane %v1500_v31, %v492_v18 }
 0x165   : > { %v427_v25 = vpop.permute.xlu0 %426 }
 0x166   : > { %1331 = vmatprep.mubr.msk.bf16.mxu1 %vm518_vm5, %v482_v24  ;;  %v470_v33 = vadd.f32 %v427_v25, %v390_v26 }
 0x167   : > { %v429_v27 = vpop.permute.xlu1 %428  ;;  %1332 = vmatmul.mubr.msk.bf16.vlgmr.msra.gmra.mrb[0].mxu1 %vm518_vm5, %v483_v21 }
 0x168   : > { %v471_v34 = vadd.f32 %v429_v27, %v391_v29 }
 0x169   : > { %v431_v35 = vpop.permute.xlu0 %430 }
 0x16a   : > { %v484_v36 = vpack.c.bf16 %v471_v34, %v470_v33  ;;  %v472_v42 = vadd.f32 %v431_v35, %v392_v37 }
 0x16b   : > { %v433_v39 = vpop.permute.xlu1 %432 }
 0x16c   : > { %v473_v43 = vadd.f32 %v433_v39, %v393_v38  ;;  %1335 = vmatprep.mubr.msk.bf16.mxu1 %vm518_vm5, %v484_v36 }
 0x16d   : > { %v435_v44 = vpop.permute.xlu0 %434 }
 0x16e   : > { %v485_v45 = vpack.c.bf16 %v473_v43, %v472_v42  ;;  %v474_v51 = vadd.f32 %v435_v44, %v394_v46 }
 0x16f   : > { %v437_v48 = vpop.permute.xlu1 %436 }
 0x170   : > { %v475_v53 = vadd.f32 %v437_v48, %v395_v47  ;;  %1336 = vmatmul.mubr.msk.bf16.gmra.mrb[4].mxu1 %vm518_vm5, %v485_v45 }
 0x171   : > { %v439_v54 = vpop.permute.xlu0 %438 }
 0x172   : > { %v486_v58 = vpack.c.bf16 %v475_v53, %v474_v51  ;;  %v476_v63 = vadd.f32 %v439_v54, %v396_v59 }
 0x173   : > { %v441_v55 = vpop.permute.xlu1 %440 }
 0x174   : > { %v477_v0 = vadd.f32 %v441_v55, %v397_v52  ;;  %1339 = vmatprep.mubr.msk.bf16.mxu1 %vm518_vm5, %v486_v58 }
 0x175   : > { %v443_v2 = vpop.permute.xlu0 %442 }
 0x176   : > { %v487_v5 = vpack.c.bf16 %v477_v0, %v476_v63  ;;  %v478_v9 = vadd.f32 %v443_v2, %v398_v6 }
 0x177   : > { %v445_v57 = vpop.permute.xlu1 %444 }
 0x178   : > { %v479_v10 = vadd.f32 %v445_v57, %v399_v56  ;;  %1340 = vmatmul.mubr.msk.bf16.gmra.mrb[8].mxu1 %vm518_vm5, %v487_v5  ;;  %v1409_v57 = vld [vmem:[%s1755_s1 + $0x48] sm:$0xff]  }
 0x179   : > { %v447_v11 = vpop.permute.xlu0 %446  ;;  %1371 = vmatprep.subr.bf16.mxu1 %v1409_v57 }
 0x17a   : > { %v488_v12 = vpack.c.bf16 %v479_v10, %v478_v9  ;;  %v480_v14 = vadd.f32 %v447_v11, %v400_v13  ;;  %1372 = vmatpush3.bf16.msra.mxu1 %v1409_v57 }
 0x17b   : > { %v449_v1 = vpop.permute.xlu1 %448  ;;  %1373 = vmatprep.subr.bf16.mxu1 %v1410_v7 }
 0x17c   : > { %v481_v15 = vadd.f32 %v449_v1, %v401_v62  ;;  %1343 = vmatprep.mubr.msk.bf16.mxu1 %vm518_vm5, %v488_v12 }
 0x17e   : > { %v489_v16 = vpack.c.bf16 %v481_v15, %v480_v14  ;;  %1374 = vmatpush3.bf16.msra.mxu1 %v1410_v7 }
 0x180   : > { %1344 = vmatmul.mubr.msk.bf16.gmra.mrb[12].mxu1 %vm518_vm5, %v489_v16 }
 0x23a   : > { %v1333_v4 = vpop.f32.mrb[0].mxu1 }
 0x23b   : > { %v586_v19 = vadd.f32 %v1333_v4, %v1634_v3  ;;  %v577_v20 = vpop.f32.mrb[1].mxu1 }
 0x23c   : > { %v578_v21 = vadd.f32 %v577_v20, %v1634_v3  ;;  %v1334_v22 = vpop.f32.mrb[2].mxu1 }
 0x23d   : > { %v658_v23 = vmul.f32 0.01, %v586_v19  ;;  %v589_v24 = vadd.f32 %v1334_v22, %v1634_v3  ;;  %v580_v25 = vpop.f32.mrb[3].mxu1  ;;  %vm642_vm2 = vcmp.gt.f32.partialorder %v586_v19, 0.0 }
 0x23e   : > { %v656_v26 = vmul.f32 0.01, %v578_v21  ;;  %v581_v27 = vadd.f32 %v580_v25, %v1634_v3  ;;  %909 = vrot.lane.b32.xlu0 %v578_v21, %s1419_s4  ;;  %vm640_vm3 = vcmp.gt.f32.partialorder %v578_v21, 0.0 }
 0x23f   : > { %vm643_vm4 = vcmp.gt.f32.partialorder %v589_v24, 0.0  ;;  %v659_v29 = vmul.f32 0.01, %v589_v24  ;;  %v674_v32 = vsel %vm642_vm2, %v586_v19, %v658_v23 }
 0x240   : > { %vm641_vm6 = vcmp.gt.f32.partialorder %v581_v27, 0.0  ;;  %v657_v30 = vmul.f32 0.01, %v581_v27  ;;  %911 = vrot.lane.b32.xlu1 %v581_v27, %s1419_s4  ;;  %v672_v35 = vsel %vm640_vm3, %v578_v21, %v656_v26 }
 0x241   : > { %v675_v33 = vsel %vm643_vm4, %v589_v24, %v659_v29 }
 0x242   : > { %v689_v34 = vpack.c.bf16 %v675_v33, %v674_v32  ;;  %913 = vrot.lane.b32.xlu0 %v586_v19, %s1419_s4  ;;  %v673_v36 = vsel %vm641_vm6, %v581_v27, %v657_v30 }
 0x243   : > { %v1337_v37 = vpop.f32.mrb[4].mxu1  ;;  %v688_v38 = vpack.c.bf16 %v673_v36, %v672_v35 }
 0x244   : > { %v602_v39 = vadd.f32 %v1337_v37, %v1634_v3  ;;  %v593_v40 = vpop.f32.mrb[5].mxu1  ;;  %915 = vrot.lane.b32.xlu1 %v589_v24, %s1419_s4 }
 0x245   : > { %v594_v41 = vadd.f32 %v593_v40, %v1634_v3  ;;  %v1338_v42 = vpop.f32.mrb[6].mxu1  ;;  %1355 = vmatprep.mubr.msk.bf16.mxu0 %vm518_vm5, %v688_v38 }
 0x246   : > { %v662_v43 = vmul.f32 0.01, %v602_v39  ;;  %v605_v44 = vadd.f32 %v1338_v42, %v1634_v3  ;;  %v596_v45 = vpop.f32.mrb[7].mxu1  ;;  %1356 = vmatmul.mubr.msk.bf16.vlgmr.msra.gmra.mrb[16].mxu0 %vm518_vm5, %v689_v34  ;;  %vm646_vm7 = vcmp.gt.f32.partialorder %v602_v39, 0.0  ;;  %v698_v34 = vsub.s32 2, %v1491_v28 }
 0x247   : > { %v660_v46 = vmul.f32 0.01, %v594_v41  ;;  %v597_v47 = vadd.f32 %v596_v45, %v1634_v3  ;;  %917 = vrot.lane.b32.xlu0 %v594_v41, %s1419_s4  ;;  %vm644_vm8 = vcmp.gt.f32.partialorder %v594_v41, 0.0 }
 0x248   : > { %vm647_vm9 = vcmp.gt.f32.partialorder %v605_v44, 0.0  ;;  %v663_v48 = vmul.f32 0.01, %v605_v44  ;;  %v678_v50 = vsel %vm646_vm7, %v602_v39, %v662_v43  ;;  %v1684_v37 = vrot.slane %v1500_v31, %v698_v34 }
 0x249   : > { %vm645_vm10 = vcmp.gt.f32.partialorder %v597_v47, 0.0  ;;  %v661_v49 = vmul.f32 0.01, %v597_v47  ;;  %919 = vrot.lane.b32.xlu1 %v597_v47, %s1419_s4  ;;  %v676_v54 = vsel %vm644_vm8, %v594_v41, %v660_v46  ;;  %vm993_vm7 = vcmask 261120  }
 0x24a   : > { %v679_v51 = vsel %vm647_vm9, %v605_v44, %v663_v48 }
 0x24b   : > { %v1341_v53 = vpop.f32.mrb[8].mxu1  ;;  %921 = vrot.lane.b32.xlu0 %v602_v39, %s1419_s4  ;;  %v677_v58 = vsel %vm645_vm10, %v597_v47, %v661_v49  ;;  %v691_v59 = vpack.c.bf16 %v679_v51, %v678_v50 }
 0x24c   : > { %v618_v52 = vadd.f32 %v1341_v53, %v1634_v3  ;;  %v609_v55 = vpop.f32.mrb[9].mxu1  ;;  %v690_v60 = vpack.c.bf16 %v677_v58, %v676_v54 }
 0x24d   : > { %v610_v61 = vadd.f32 %v609_v55, %v1634_v3  ;;  %v1342_v63 = vpop.f32.mrb[10].mxu1  ;;  %923 = vrot.lane.b32.xlu1 %v605_v44, %s1419_s4 }
 0x24e   : > { %v666_v0 = vmul.f32 0.01, %v618_v52  ;;  %v621_v2 = vadd.f32 %v1342_v63, %v1634_v3  ;;  %v612_v5 = vpop.f32.mrb[11].mxu1  ;;  %1359 = vmatprep.mubr.msk.bf16.mxu0 %vm518_vm5, %v690_v60  ;;  %vm650_vm11 = vcmp.gt.f32.partialorder %v618_v52, 0.0 }
 0x24f   : > { %v664_v6 = vmul.f32 0.01, %v610_v61  ;;  %v613_v56 = vadd.f32 %v612_v5, %v1634_v3  ;;  %925 = vrot.lane.b32.xlu0 %v610_v61, %s1419_s4  ;;  %1360 = vmatmul.mubr.msk.bf16.gmra.mrb[20].mxu0 %vm518_vm5, %v691_v59  ;;  %vm648_vm12 = vcmp.gt.f32.partialorder %v610_v61, 0.0 }
 0x250   : > { %vm651_vm13 = vcmp.gt.f32.partialorder %v621_v2, 0.0  ;;  %v667_v8 = vmul.f32 0.01, %v621_v2  ;;  %v682_v10 = vsel %vm650_vm11, %v618_v52, %v666_v0 }
 0x251   : > { %vm649_vm14 = vcmp.gt.f32.partialorder %v613_v56, 0.0  ;;  %v665_v9 = vmul.f32 0.01, %v613_v56  ;;  %927 = vrot.lane.b32.xlu1 %v613_v56, %s1419_s4  ;;  %v680_v13 = vsel %vm648_vm12, %v610_v61, %v664_v6 }
 0x252   : > { %v683_v11 = vsel %vm651_vm13, %v621_v2, %v667_v8 }
 0x253   : > { %v1345_v12 = vpop.f32.mrb[12].mxu1  ;;  %929 = vrot.lane.b32.xlu0 %v618_v52, %s1419_s4  ;;  %v681_v62 = vsel %vm649_vm14, %v613_v56, %v665_v9  ;;  %v693_v1 = vpack.c.bf16 %v683_v11, %v682_v10 }
 0x254   : > { %v634_v14 = vadd.f32 %v1345_v12, %v1634_v3  ;;  %v625_v15 = vpop.f32.mrb[13].mxu1  ;;  %v692_v16 = vpack.c.bf16 %v681_v62, %v680_v13 }
 0x255   : > { %v626_v17 = vadd.f32 %v625_v15, %v1634_v3  ;;  %v1346_v18 = vpop.f32.mrb[14].mxu1  ;;  %931 = vrot.lane.b32.xlu1 %v621_v2, %s1419_s4 }
 0x256   : > { %v670_v4 = vmul.f32 0.01, %v634_v14  ;;  %v637_v19 = vadd.f32 %v1346_v18, %v1634_v3  ;;  %v628_v20 = vpop.f32.mrb[15].mxu1  ;;  %1363 = vmatprep.mubr.msk.bf16.mxu0 %vm518_vm5, %v692_v16  ;;  %vm654_vm15 = vcmp.gt.f32.partialorder %v634_v14, 0.0 }
 0x257   : > { %v668_v21 = vmul.f32 0.01, %v626_v17  ;;  %v629_v22 = vadd.f32 %v628_v20, %v1634_v3  ;;  %933 = vrot.lane.b32.xlu0 %v626_v17, %s1419_s4  ;;  %1364 = vmatmul.mubr.msk.bf16.gmra.mrb[24].mxu0 %vm518_vm5, %v693_v1  ;;  %vm652_vm0 = vcmp.gt.f32.partialorder %v626_v17, 0.0 }
 0x258   : > { %vm655_vm1 = vcmp.gt.f32.partialorder %v637_v19, 0.0  ;;  %v671_v23 = vmul.f32 0.01, %v637_v19  ;;  %v686_v25 = vsel %vm654_vm15, %v634_v14, %v670_v4 }
 0x259   : > { %vm653_vm2 = vcmp.gt.f32.partialorder %v629_v22, 0.0  ;;  %v669_v24 = vmul.f32 0.01, %v629_v22  ;;  %935 = vrot.lane.b32.xlu1 %v629_v22, %s1419_s4  ;;  %v684_v27 = vsel %vm652_vm0, %v626_v17, %v668_v21 }
 0x25a   : > { %v687_v26 = vsel %vm655_vm1, %v637_v19, %v671_v23 }
 0x25b   : > { %937 = vrot.lane.b32.xlu0 %v634_v14, %s1419_s4  ;;  %v685_v29 = vsel %vm653_vm2, %v629_v22, %v669_v24  ;;  %v695_v30 = vpack.c.bf16 %v687_v26, %v686_v25 }
 0x25c   : > { %v694_v32 = vpack.c.bf16 %v685_v29, %v684_v27 }
 0x25d   : > { %939 = vrot.lane.b32.xlu1 %v637_v19, %s1419_s4 }
 0x25e   : > { %1367 = vmatprep.mubr.msk.bf16.mxu0 %vm518_vm5, %v694_v32 }
 0x25f   : > { %1368 = vmatmul.mubr.msk.bf16.gmra.mrb[28].mxu0 %vm518_vm5, %v695_v30 }
 0x2b0   : > { %v910_v3 = vpop.permute.xlu0 %909 }
 0x2b2   : > { %v912_v33 = vpop.permute.xlu1 %911 }
 0x2b4   : > { %v914_v35 = vpop.permute.xlu0 %913 }
 0x2b6   : > { %v916_v36 = vpop.permute.xlu1 %915 }
 0x2b9   : > { %v918_v39 = vpop.permute.xlu0 %917 }
 0x2bb   : > { %v920_v42 = vpop.permute.xlu1 %919 }
 0x2bd   : > { %v922_v58 = vpop.permute.xlu0 %921 }
 0x2bf   : > { %v924_v52 = vpop.permute.xlu1 %923 }
 0x2c1   : > { %v926_v12 = vpop.permute.xlu0 %925 }
 0x2c3   : > { %v928_v1 = vpop.permute.xlu1 %927 }
 0x2c5   : > { %v930_v26 = vpop.permute.xlu0 %929 }
 0x2c7   : > { %v932_v32 = vpop.permute.xlu1 %931 }
 0x319   : > { %v1357_v38 = vpop.f32.mrb[16].mxu0 }
 0x31a   : > { %v791_v40 = vadd.f32 %v1357_v38, %v1684_v37  ;;  %v782_v41 = vpop.f32.mrb[17].mxu0 }
 0x31b   : > { %v783_v43 = vadd.f32 %v782_v41, %v1684_v37  ;;  %v1358_v44 = vpop.f32.mrb[18].mxu0 }
 0x31c   : > { %vm847_vm3 = vcmp.gt.f32.partialorder %v791_v40, 0.0  ;;  %v863_v45 = vmul.f32 0.01, %v791_v40  ;;  %v794_v46 = vadd.f32 %v1358_v44, %v1684_v37  ;;  %v785_v47 = vpop.f32.mrb[19].mxu0  ;;  %v934_v44 = vpop.permute.xlu0 %933 }
 0x31d   : > { %vm845_vm5 = vcmp.gt.f32.partialorder %v783_v43, 0.0  ;;  %v861_v48 = vmul.f32 0.01, %v783_v43  ;;  %v786_v49 = vadd.f32 %v785_v47, %v1684_v37 }
 0x31e   : > { %v879_v50 = vsel %vm847_vm3, %v791_v40, %v863_v45  ;;  %vm848_vm4 = vcmp.gt.f32.partialorder %v794_v46, 0.0  ;;  %v864_v51 = vmul.f32 0.01, %v794_v46 }
 0x31f   : > { %v877_v53 = vsel %vm845_vm5, %v783_v43, %v861_v48  ;;  %vm846_vm6 = vcmp.gt.f32.partialorder %v786_v49, 0.0  ;;  %v862_v54 = vmul.f32 0.01, %v786_v49  ;;  %v959_v55 = vadd.f32 %v914_v35, %v879_v50 }
 0x320   : > { %v880_v59 = vsel %vm848_vm4, %v794_v46, %v864_v51  ;;  %v957_v63 = vadd.f32 %v910_v3, %v877_v53  ;;  %vm1135_vm5 = vcmask 64512  }
 0x321   : > { %v960_v60 = vadd.f32 %v916_v36, %v880_v59  ;;  %v878_v61 = vsel %vm846_vm6, %v786_v49, %v862_v54  ;;  %v936_v49 = vpop.permute.xlu1 %935 }
 0x322   : > { %v958_v0 = vadd.f32 %v912_v33, %v878_v61  ;;  %v1361_v2 = vpop.f32.mrb[20].mxu0 }
 0x323   : > { %v974_v5 = vpack.c.bf16 %v960_v60, %v959_v55  ;;  %v807_v6 = vadd.f32 %v1361_v2, %v1684_v37  ;;  %v798_v56 = vpop.f32.mrb[21].mxu0 }
 0x324   : > { %v799_v57 = vadd.f32 %v798_v56, %v1684_v37  ;;  %v1362_v7 = vpop.f32.mrb[22].mxu0  ;;  %v973_v8 = vpack.c.bf16 %v958_v0, %v957_v63 }
 0x325   : > { %vm851_vm8 = vcmp.gt.f32.partialorder %v807_v6, 0.0  ;;  %v867_v9 = vmul.f32 0.01, %v807_v6  ;;  %v810_v10 = vadd.f32 %v1362_v7, %v1684_v37  ;;  %v801_v11 = vpop.f32.mrb[23].mxu0  ;;  %v938_v7 = vpop.permute.xlu0 %937 }
 0x326   : > { %vm849_vm9 = vcmp.gt.f32.partialorder %v799_v57, 0.0  ;;  %v865_v13 = vmul.f32 0.01, %v799_v57  ;;  %v802_v62 = vadd.f32 %v801_v11, %v1684_v37  ;;  %1375 = vmatprep.mubr.msk.bf16.mxu1 %vm993_vm7, %v973_v8  ;;  %v940_v8 = vpop.permute.xlu1 %939 }
 0x327   : > { %v883_v14 = vsel %vm851_vm8, %v807_v6, %v867_v9  ;;  %vm852_vm10 = vcmp.gt.f32.partialorder %v810_v10, 0.0  ;;  %v868_v15 = vmul.f32 0.01, %v810_v10  ;;  %1376 = vmatmul.mubr.msk.bf16.vlgmr.msra.gmra.mrb[16].mxu1 %vm993_vm7, %v974_v5 }
 0x328   : > { %v881_v16 = vsel %vm849_vm9, %v799_v57, %v865_v13  ;;  %vm850_vm11 = vcmp.gt.f32.partialorder %v802_v62, 0.0  ;;  %v866_v17 = vmul.f32 0.01, %v802_v62  ;;  %v963_v4 = vadd.f32 %v922_v58, %v883_v14 }
 0x329   : > { %v884_v18 = vsel %vm852_vm10, %v810_v10, %v868_v15  ;;  %v961_v22 = vadd.f32 %v918_v39, %v881_v16  ;;  %v1117_v14 = vsub.s32 3, %v1491_v28 }
 0x32a   : > { %v964_v19 = vadd.f32 %v924_v52, %v884_v18  ;;  %v882_v20 = vsel %vm850_vm11, %v802_v62, %v866_v17  ;;  %v1365_v21 = vpop.f32.mrb[24].mxu0 }
 0x32b   : > { %v962_v23 = vadd.f32 %v920_v42, %v882_v20  ;;  %v823_v24 = vadd.f32 %v1365_v21, %v1684_v37  ;;  %v814_v25 = vpop.f32.mrb[25].mxu0  ;;  %v1118_v15 = vrot.slane %v1500_v31, %v1117_v14 }
 0x32c   : > { %v815_v27 = vadd.f32 %v814_v25, %v1684_v37  ;;  %v1366_v29 = vpop.f32.mrb[26].mxu0  ;;  %v976_v30 = vpack.c.bf16 %v964_v19, %v963_v4 }
 0x32d   : > { %vm855_vm12 = vcmp.gt.f32.partialorder %v823_v24, 0.0  ;;  %v871_v3 = vmul.f32 0.01, %v823_v24  ;;  %v826_v33 = vadd.f32 %v1366_v29, %v1684_v37  ;;  %v817_v34 = vpop.f32.mrb[27].mxu0  ;;  %v975_v35 = vpack.c.bf16 %v962_v23, %v961_v22 }
 0x32e   : > { %vm853_vm13 = vcmp.gt.f32.partialorder %v815_v27, 0.0  ;;  %v869_v36 = vmul.f32 0.01, %v815_v27  ;;  %v818_v38 = vadd.f32 %v817_v34, %v1684_v37 }
 0x32f   : > { %v887_v39 = vsel %vm855_vm12, %v823_v24, %v871_v3  ;;  %vm856_vm14 = vcmp.gt.f32.partialorder %v826_v33, 0.0  ;;  %v872_v40 = vmul.f32 0.01, %v826_v33  ;;  %1379 = vmatprep.mubr.msk.bf16.mxu1 %vm993_vm7, %v975_v35 }
 0x330   : > { %v885_v41 = vsel %vm853_vm13, %v815_v27, %v869_v36  ;;  %vm854_vm15 = vcmp.gt.f32.partialorder %v818_v38, 0.0  ;;  %v870_v42 = vmul.f32 0.01, %v818_v38  ;;  %1380 = vmatmul.mubr.msk.bf16.gmra.mrb[20].mxu1 %vm993_vm7, %v976_v30  ;;  %v967_v45 = vadd.f32 %v930_v26, %v887_v39 }
 0x331   : > { %v888_v43 = vsel %vm856_vm14, %v826_v33, %v872_v40  ;;  %v965_v50 = vadd.f32 %v926_v12, %v885_v41 }
 0x332   : > { %v968_v46 = vadd.f32 %v932_v32, %v888_v43  ;;  %v886_v47 = vsel %vm854_vm15, %v818_v38, %v870_v42  ;;  %v1369_v48 = vpop.f32.mrb[28].mxu0 }
 0x333   : > { %v966_v51 = vadd.f32 %v928_v1, %v886_v47  ;;  %v839_v53 = vadd.f32 %v1369_v48, %v1684_v37  ;;  %v830_v54 = vpop.f32.mrb[29].mxu0 }
 0x334   : > { %v831_v58 = vadd.f32 %v830_v54, %v1684_v37  ;;  %v1370_v59 = vpop.f32.mrb[30].mxu0  ;;  %v978_v52 = vpack.c.bf16 %v968_v46, %v967_v45 }
 0x335   : > { %vm859_vm0 = vcmp.gt.f32.partialorder %v839_v53, 0.0  ;;  %v875_v55 = vmul.f32 0.01, %v839_v53  ;;  %v842_v60 = vadd.f32 %v1370_v59, %v1684_v37  ;;  %v833_v61 = vpop.f32.mrb[31].mxu0  ;;  %v977_v63 = vpack.c.bf16 %v966_v51, %v965_v50 }
 0x336   : > { %vm857_vm1 = vcmp.gt.f32.partialorder %v831_v58, 0.0  ;;  %v873_v0 = vmul.f32 0.01, %v831_v58  ;;  %v834_v2 = vadd.f32 %v833_v61, %v1684_v37 }
 0x337   : > { %v891_v5 = vsel %vm859_vm0, %v839_v53, %v875_v55  ;;  %vm860_vm2 = vcmp.gt.f32.partialorder %v842_v60, 0.0  ;;  %v876_v6 = vmul.f32 0.01, %v842_v60  ;;  %1383 = vmatprep.mubr.msk.bf16.mxu1 %vm993_vm7, %v977_v63 }
 0x338   : > { %v889_v56 = vsel %vm857_vm1, %v831_v58, %v873_v0  ;;  %vm858_vm3 = vcmp.gt.f32.partialorder %v834_v2, 0.0  ;;  %v874_v57 = vmul.f32 0.01, %v834_v2  ;;  %1384 = vmatmul.mubr.msk.bf16.gmra.mrb[24].mxu1 %vm993_vm7, %v978_v52  ;;  %v971_v10 = vadd.f32 %v938_v7, %v891_v5 }
 0x339   : > { %v892_v9 = vsel %vm860_vm2, %v842_v60, %v876_v6  ;;  %v969_v13 = vadd.f32 %v934_v44, %v889_v56 }
 0x33a   : > { %v972_v11 = vadd.f32 %v940_v8, %v892_v9  ;;  %v890_v12 = vsel %vm858_vm3, %v834_v2, %v874_v57 }
 0x33b   : > { %v970_v62 = vadd.f32 %v936_v49, %v890_v12 }
 0x33c   : > { %v980_v37 = vpack.c.bf16 %v972_v11, %v971_v10 }
 0x33d   : > { %v979_v1 = vpack.c.bf16 %v970_v62, %v969_v13 }
 0x33f   : > { %1387 = vmatprep.mubr.msk.bf16.mxu1 %vm993_vm7, %v979_v1 }
 0x340   : > { %1388 = vmatmul.mubr.msk.bf16.gmra.mrb[28].mxu1 %vm993_vm7, %v980_v37 }
 0x3fa   : > { %v1377_v16 = vpop.f32.mrb[16].mxu1 }
 0x3fb   : > { %v1121_v17 = vadd.f32 %v1377_v16, %v1118_v15  ;;  %v1052_v18 = vpop.f32.mrb[17].mxu1 }
 0x3fc   : > { %v1119_v4 = vadd.f32 %v1118_v15, %v1052_v18  ;;  %v1378_v19 = vpop.f32.mrb[18].mxu1 }
 0x3fd   : > { %1138 = vst.msk [vmem:[%s1717_s22 + $0x10] sm:$0xff] %vm1135_vm5, %v1121_v17  ;;  %v1122_v28 = vadd.f32 %v1378_v19, %v1118_v15  ;;  %v1055_v31 = vpop.f32.mrb[19].mxu1 }
 0x3fe   : > { %1136 = vst.msk [vmem:[%s1717_s22] sm:$0xff] %vm1135_vm5, %v1119_v4  ;;  %v1120_v20 = vadd.f32 %v1118_v15, %v1055_v31 }
 0x3ff   : > { %1139 = vst.msk [vmem:[%s1717_s22 + $0x18] sm:$0xff] %vm1135_vm5, %v1122_v28 }
 0x400   : > { %1137 = vst.msk [vmem:[%s1717_s22 + $0x8] sm:$0xff] %vm1135_vm5, %v1120_v20 }
 0x403   : > { %v1381_v21 = vpop.f32.mrb[20].mxu1 }
 0x404   : > { %v1125_v22 = vadd.f32 %v1381_v21, %v1118_v15  ;;  %v1068_v23 = vpop.f32.mrb[21].mxu1 }
 0x405   : > { %v1123_v24 = vadd.f32 %v1118_v15, %v1068_v23  ;;  %v1382_v25 = vpop.f32.mrb[22].mxu1 }
 0x406   : > { %1142 = vst.msk [vmem:[%s1717_s22 + $0x30] sm:$0xff] %vm1135_vm5, %v1125_v22  ;;  %v1126_v26 = vadd.f32 %v1382_v25, %v1118_v15  ;;  %v1071_v27 = vpop.f32.mrb[23].mxu1 }
 0x407   : > { %1140 = vst.msk [vmem:[%s1717_s22 + $0x20] sm:$0xff] %vm1135_vm5, %v1123_v24  ;;  %v1124_v29 = vadd.f32 %v1118_v15, %v1071_v27 }
 0x408   : > { %1143 = vst.msk [vmem:[%s1717_s22 + $0x38] sm:$0xff] %vm1135_vm5, %v1126_v26 }
 0x409   : > { %1141 = vst.msk [vmem:[%s1717_s22 + $0x28] sm:$0xff] %vm1135_vm5, %v1124_v29 }
 0x40b   : > { %v1385_v30 = vpop.f32.mrb[24].mxu1 }
 0x40c   : > { %v1129_v32 = vadd.f32 %v1385_v30, %v1118_v15  ;;  %v1084_v3 = vpop.f32.mrb[25].mxu1 }
 0x40d   : > { %v1127_v33 = vadd.f32 %v1118_v15, %v1084_v3  ;;  %v1386_v34 = vpop.f32.mrb[26].mxu1 }
 0x40e   : > { %1146 = vst.msk [vmem:[%s1717_s22 + $0x50] sm:$0xff] %vm1135_vm5, %v1129_v32  ;;  %v1130_v35 = vadd.f32 %v1386_v34, %v1118_v15  ;;  %v1087_v36 = vpop.f32.mrb[27].mxu1 }
 0x40f   : > { %1144 = vst.msk [vmem:[%s1717_s22 + $0x40] sm:$0xff] %vm1135_vm5, %v1127_v33  ;;  %v1128_v38 = vadd.f32 %v1118_v15, %v1087_v36 }
 0x410   : > { %1147 = vst.msk [vmem:[%s1717_s22 + $0x58] sm:$0xff] %vm1135_vm5, %v1130_v35 }
 0x411   : > { %1145 = vst.msk [vmem:[%s1717_s22 + $0x48] sm:$0xff] %vm1135_vm5, %v1128_v38 }
 0x413   : > { %v1389_v39 = vpop.f32.mrb[28].mxu1 }
 0x414   : > { %v1133_v40 = vadd.f32 %v1389_v39, %v1118_v15  ;;  %v1100_v41 = vpop.f32.mrb[29].mxu1 }
 0x415   : > { %v1131_v42 = vadd.f32 %v1118_v15, %v1100_v41  ;;  %v1390_v43 = vpop.f32.mrb[30].mxu1 }
 0x416   : > { %1150 = vst.msk [vmem:[%s1717_s22 + $0x70] sm:$0xff] %vm1135_vm5, %v1133_v40  ;;  %v1134_v44 = vadd.f32 %v1390_v43, %v1118_v15  ;;  %v1103_v45 = vpop.f32.mrb[31].mxu1 }
 0x417   : > { %1148 = vst.msk [vmem:[%s1717_s22 + $0x60] sm:$0xff] %vm1135_vm5, %v1131_v42  ;;  %v1132_v46 = vadd.f32 %v1118_v15, %v1103_v45 }
 0x418   : > { %1151 = vst.msk [vmem:[%s1717_s22 + $0x78] sm:$0xff] %vm1135_vm5, %v1134_v44 }
 0x419   : > { %1149 = vst.msk [vmem:[%s1717_s22 + $0x68] sm:$0xff] %vm1135_vm5, %v1132_v46 }
 0x41a PF: > { %s13_s12 = sadd.s32 1, %s1417_s12  }
 0x41b   : > { %p10_p4 = scmp.ge.s32.totalorder %s13_s12, 4  }
 0x41d   :  { %12 = sbr.rel (!%p10_p4) target bundleno = 1 (0x1), region = 62 }

</bundles_post_ra>
